<compile_context>
chip_gen: v7x
topology: tpu7x:2x2x1
jax: 0.10.0
libtpu: 0.0.40
codegen_flags: <defaults>
</compile_context>

<pallas_src>
import math

import jax
import jax.numpy as jnp
import numpy as np
from jax.experimental import pallas as pl
from jax.experimental.pallas import tpu as pltpu


def _round_up(v, m):
    return ((v + m - 1) // m) * m


def _split_dim(dim, cap, align=128):
    """Pick (tile, padded_dim) with tile <= cap, tile % align == 0, padded % tile == 0."""
    padded = _round_up(max(int(dim), 1), align)
    if padded <= cap:
        return padded, padded
    g = -(-padded // cap)                      # ceil div: number of tiles
    tile = _round_up(-(-padded // g), align)   # minimal aligned tile
    return tile, tile * g


def _get_vmem_limit_bytes():
    """Generation-aware scoped-VMEM budget (~3/4 of physical, capped at 96 MiB)."""
    cap = 128 * 1024 * 1024
    try:
        info = pltpu.get_tpu_info()
        cap = int(getattr(info, "vmem_capacity_bytes", cap))
    except Exception:
        pass
    return min((cap * 3) // 4, 96 * 1024 * 1024)


# ----------------------------------------------------------------------------
# Kernels
# ----------------------------------------------------------------------------

def _bio_linear_kernel_single_k(x_ref, w_ref, b_ref, o_ref):
    # x: (tm, pk), w: (pk, tn) [pre-transposed], b: (1, tn) -> o: (tm, tn)
    o_ref[...] = (
        jnp.dot(x_ref[...], w_ref[...], preferred_element_type=jnp.float32)
        + b_ref[...]
    ).astype(o_ref.dtype)


def _bio_linear_kernel_kloop(x_ref, w_ref, b_ref, o_ref):
    # x: (tm, tk), w: (tk, tn), b: (1, tn) -> o: (tm, tn); accumulate in o_ref.
    k = pl.program_id(2)
    acc = jnp.dot(x_ref[...], w_ref[...], preferred_element_type=jnp.float32)

    @pl.when(k == 0)
    def _():
        o_ref[...] = (acc + b_ref[...]).astype(o_ref.dtype)

    @pl.when(k != 0)
    def _():
        o_ref[...] += acc.astype(o_ref.dtype)


# ----------------------------------------------------------------------------
# Wrapper
# ----------------------------------------------------------------------------

def bio_linear_forward(x, w_p, b_p, out_dim, *, tm_cap, tn, tk, vmem_limit):
    """y = x @ W.T + b with W already transposed+padded to w_p:(pk,pn), b_p:(1,pn)."""
    batch, in_dim = x.shape
    pk, pn = w_p.shape

    tm, pb = _split_dim(batch, tm_cap, align=8)

    if (pb, pk) != (batch, in_dim):
        # Zero-padding K adds exact zeros to the accumulator -> result unchanged.
        x = jnp.pad(x, ((0, pb - batch), (0, pk - in_dim)))

    gm, gn, gk = pb // tm, pn // tn, pk // tk

    if gk == 1:
        grid = (gm, gn)
        in_specs = [
            pl.BlockSpec((tm, tk), lambda i, j: (i, 0)),   # x tile (fully resident in K)
            pl.BlockSpec((tk, tn), lambda i, j: (0, j)),   # W.T tile
            pl.BlockSpec((1, tn), lambda i, j: (0, j)),    # bias tile
        ]
        out_specs = pl.BlockSpec((tm, tn), lambda i, j: (i, j))
        kernel = _bio_linear_kernel_single_k
        dims = ("parallel", "parallel")
    else:
        grid = (gm, gn, gk)
        in_specs = [
            pl.BlockSpec((tm, tk), lambda i, j, k: (i, k)),   # x tile
            pl.BlockSpec((tk, tn), lambda i, j, k: (k, j)),   # W.T tile
            pl.BlockSpec((1, tn), lambda i, j, k: (0, j)),    # bias tile
        ]
        out_specs = pl.BlockSpec((tm, tn), lambda i, j, k: (i, j))
        kernel = _bio_linear_kernel_kloop
        dims = ("parallel", "parallel", "arbitrary")

    y_p = pl.pallas_call(
        kernel,
        out_shape=jax.ShapeDtypeStruct((pb, pn), x.dtype),
        grid_spec=pltpu.PrefetchScalarGridSpec(
            num_scalar_prefetch=0,
            grid=grid,
            in_specs=in_specs,
            out_specs=out_specs,
        ),
        compiler_params=pltpu.CompilerParams(
            dimension_semantics=dims,
            vmem_limit_bytes=vmem_limit,
        ),
    )(x, w_p, b_p)

    # TODO(synk): if the next layer accepts padded activations, skip this slice
    # (it is an extra full-output HBM copy).
    if (pb, pn) != (batch, out_dim):
        y_p = y_p[:batch, :out_dim]
    return y_p


class BioLinearJax:
    """Mirror of the PyTorch BioLinear module (forward only)."""

    def __init__(self, in_dim, out_dim, in_fold=1, out_fold=1, key=None):
        assert in_dim % in_fold == 0
        assert out_dim % out_fold == 0
        self.in_dim = in_dim
        self.out_dim = out_dim
        self.in_fold = in_fold
        self.out_fold = out_fold

        in_dim_fold = in_dim // in_fold
        out_dim_fold = out_dim // out_fold
        # These coordinates only matter for bio-regularization, not forward.
        self.in_coordinates = jnp.asarray(
            list(np.linspace(1 / (2 * in_dim_fold),
                             1 - 1 / (2 * in_dim_fold),
                             num=in_dim_fold)) * in_fold,
            dtype=jnp.float32)
        self.out_coordinates = jnp.asarray(
            list(np.linspace(1 / (2 * out_dim_fold),
                             1 - 1 / (2 * out_dim_fold),
                             num=out_dim_fold)) * out_fold,
            dtype=jnp.float32)

        # Deterministic init mimicking nn.Linear default:
        # U(-1/sqrt(in_dim), 1/sqrt(in_dim)) for both weight and bias.
        if key is None:
            key = jax.random.PRNGKey(0)
        kw, kb = jax.random.split(key)
        bound = 1.0 / math.sqrt(in_dim)
        self.weight = jax.random.uniform(
            kw, (out_dim, in_dim), jnp.float32, minval=-bound, maxval=bound)
        self.bias = jax.random.uniform(
            kb, (out_dim,), jnp.float32, minval=-bound, maxval=bound)

        # ---- Hoisted, per-generation kernel configuration (done ONCE) ----
        self._vmem_limit = _get_vmem_limit_bytes()
        big_vmem = self._vmem_limit >= 64 * 1024 * 1024   # v5e/v6e (128 MiB) vs v7x (64 MiB)
        weight_tile_cap = 2048 if big_vmem else 1024
        self._tm_cap = 1024 if big_vmem else 512

        self._tk, pk = _split_dim(in_dim, weight_tile_cap)
        self._tn, pn = _split_dim(out_dim, weight_tile_cap)

        # Hoisted weight transpose + pad and bias pad (cached; not re-done per call).
        self._w_p = jnp.pad(self.weight.T,
                            ((0, pk - in_dim), (0, pn - out_dim)))
        self._b_p = jnp.pad(self.bias, (0, pn - out_dim)).reshape(1, pn)

        self.input = None
        self.output = None

    def __call__(self, x):
        self.input = x  # mirrors self.input = x.clone()
        self.output = bio_linear_forward(
            x, self._w_p, self._b_p, self.out_dim,
            tm_cap=self._tm_cap, tn=self._tn, tk=self._tk,
            vmem_limit=self._vmem_limit)
        return self.output


if __name__ == "__main__":
    key = jax.random.PRNGKey(0)
    k_x, k_params = jax.random.split(key)

    batch, in_dim, out_dim = 8, 32, 64
    x = jax.random.normal(k_x, (batch, in_dim), dtype=jnp.float32)

    layer = BioLinearJax(in_dim, out_dim, in_fold=1, out_fold=1, key=k_params)
    y = layer(x)
    y = jax.block_until_ready(y)

    # Reference check in plain JAX.
    y_ref = x @ layer.weight.T + layer.bias
    assert y.shape == (batch, out_dim)
    np.testing.assert_allclose(np.asarray(y), np.asarray(y_ref),
                               rtol=1e-5, atol=1e-5)

    print("KERNEL_OK")
</pallas_src>

<mosaic_0001>
module attributes {stable_mosaic.version = 11 : i64} {
  func.func @_bio_linear_kernel_single_k(%arg0: i32, %arg1: i32, %arg2: memref<8x128xf32, #tpu.memory_space<vmem>>, %arg3: memref<128x128xf32, #tpu.memory_space<vmem>>, %arg4: memref<1x128xf32, #tpu.memory_space<vmem>>, %arg5: memref<8x128xf32, #tpu.memory_space<vmem>>) attributes {dimension_semantics = [#tpu.dimension_semantics<parallel>, #tpu.dimension_semantics<parallel>], iteration_bounds = array<i64: 1, 1>, scalar_prefetch = 0 : i64, scratch_operands = 0 : i64, tpu.core_type = #tpu.core_type<tc>, window_params = [{transform_indices = @transform_0, window_bounds = array<i64: 8, 128>}, {transform_indices = @transform_1, window_bounds = array<i64: 128, 128>}, {transform_indices = @transform_2, window_bounds = array<i64: 1, 128>}, {transform_indices = @transform_3, window_bounds = array<i64: 8, 128>}]} {
    %c0 = arith.constant 0 : index
    %c0_0 = arith.constant 0 : index
    %0 = vector.load %arg2[%c0, %c0_0] : memref<8x128xf32, #tpu.memory_space<vmem>>, vector<8x128xf32>
    %c0_1 = arith.constant 0 : index
    %c0_2 = arith.constant 0 : index
    %1 = vector.load %arg3[%c0_1, %c0_2] : memref<128x128xf32, #tpu.memory_space<vmem>>, vector<128x128xf32>
    %cst = arith.constant dense<0.000000e+00> : vector<8x128xf32>
    %2 = tpu.matmul %0, %1, %cst {dimension_numbers = #tpu.dot_dimension_numbers<[1], [0], [0], [1], [0, 0, 1, 1], [], []>} : vector<8x128xf32>, vector<128x128xf32>, vector<8x128xf32> -> vector<8x128xf32>
    %c0_3 = arith.constant 0 : index
    %c0_4 = arith.constant 0 : index
    %3 = vector.load %arg4[%c0_3, %c0_4] : memref<1x128xf32, #tpu.memory_space<vmem>>, vector<1x128xf32>
    %4 = vector.broadcast %3 : vector<1x128xf32> to vector<8x128xf32>
    %5 = arith.addf %2, %4 : vector<8x128xf32>
    %c0_5 = arith.constant 0 : index
    %c0_6 = arith.constant 0 : index
    %6 = vector.load %arg5[%c0_5, %c0_6] : memref<8x128xf32, #tpu.memory_space<vmem>>, vector<8x128xf32>
    tpu.vector_store %arg5[%c0_5, %c0_6], %5 {strides = array<i32>} : memref<8x128xf32, #tpu.memory_space<vmem>>, vector<8x128xf32>,
    return
  }
  func.func @transform_0(%arg0: i32, %arg1: i32) -> (i32, i32) {
    %c0_i32 = arith.constant 0 : i32
    %c0_i32_0 = arith.constant 0 : i32
    return %arg0, %c0_i32 : i32, i32
  }
  func.func @transform_1(%arg0: i32, %arg1: i32) -> (i32, i32) {
    %c0_i32 = arith.constant 0 : i32
    %c0_i32_0 = arith.constant 0 : i32
    return %c0_i32, %arg1 : i32, i32
  }
  func.func @transform_2(%arg0: i32, %arg1: i32) -> (i32, i32) {
    %c0_i32 = arith.constant 0 : i32
    %c0_i32_0 = arith.constant 0 : i32
    return %c0_i32, %arg1 : i32, i32
  }
  func.func @transform_3(%arg0: i32, %arg1: i32) -> (i32, i32) {
    %c0_i32 = arith.constant 0 : i32
    return %arg0, %arg1 : i32, i32
  }
}

</mosaic_0001>

<bundles_post_ra>
// kernel: tpu_custom_call.1
= control target key start
LH: loop header
LB: loop body
LE: loop exit
PB: predicated region body
PF: predicated region fallthrough
CT: control target
= control target key end

     0   :  { %8 = vsyncpa [#allocation3], 0  ;;  %s420_s0 = inlined_call_operand.hbm [shape: f32[8,128], index: 0, kind: input, shape index: {}]   ;;  %s421_s1 = inlined_call_operand.hbm [shape: f32[128,128], index: 1, kind: input, shape index: {}]   ;;  %s422_s2 = inlined_call_operand.hbm [shape: f32[1,128], index: 2, kind: input, shape index: {}]   ;;  %s423_s3 = inlined_call_operand.hbm [shape: f32[8,128], index: 3, kind: output, shape index: {}]  }
   0x1   :  { %9 = vsyncpa [#allocation6], 0 }
   0x2   :  { %10 = vsyncpa [#allocation4], 0  ;;  %s343_s12 = smov [#allocation5]   ;;  %s249_s16 = scalar_lea.hbm %s421_s1, 2048 }
   0x3   :  { %s26_s13 = sshll.u32 %s343_s12, 4  ;;  %p250_p0 = scmp.ne.s32.totalorder %s421_s1, %s249_s16  ;;  %s27_s13 = int_to_ptr.vmem [resolvable:$true] %s26_s13 }
   0x4   :  { %p253_p1 = scmp.lt.u32.totalorder %s249_s16, %s421_s1 }
   0x6   :  { %p255_p2 = pnand %p253_p1, %p250_p0 }
   0x8   :  { %258 = shalt.err (!%p255_p2)
}
   0x9   :  { %s259_s21 = scalar_lea.vmem %s27_s13, 2048  ;;  %p264_p4 = scmp.lt.s32.totalorder %s27_s13, %s27_s13 }
   0xa   :  { %p260_p3 = scmp.ne.s32.totalorder %s27_s13, %s259_s21  ;;  %p265_p5 = scmp.lt.s32.totalorder %s259_s21, %s259_s21 }
   0xc   :  { %p266_p6 = por %p265_p5, %p264_p4 }
   0xe   :  { %p267_p7 = pnand %p266_p6, %p260_p3 }
  0x10   :  { %270 = shalt.err (!%p267_p7)
}
  0x11   :  { %s344_s22 = smov 128   ;;  %s345_s23 = smov 8  }
  0x12   :  { %32 = dma.hbm_to_vmem [thread:$0]  %s421_s1, 2048, %s27_s13, [#allocation6], %s344_s22, %s344_s22, %s345_s23  }
  0x13   :  { %s346_s26 = smov [#allocation2]   ;;  %s347_s28 = smov [#allocation7]  }
  0x14   :  { %s17_s27 = sshll.u32 %s346_s26, 4  ;;  %s39_s29 = sshll.u32 %s347_s28, 4  ;;  %s18_s27 = int_to_ptr.vmem [resolvable:$true] %s17_s27  ;;  %s40_s29 = int_to_ptr.vmem [resolvable:$true] %s39_s29 }
  0x15   :  { %s271_s5 = scalar_lea.hbm %s420_s0, 128 }
  0x16   :  { %p272_p8 = scmp.ne.s32.totalorder %s420_s0, %s271_s5  ;;  %p275_p9 = scmp.lt.u32.totalorder %s271_s5, %s420_s0 }
  0x18   :  { %p277_p10 = pnand %p275_p9, %p272_p8 }
  0x1a   :  { %280 = shalt.err (!%p277_p10)
}
  0x1b   :  { %s281_s1 = scalar_lea.vmem %s18_s27, 128  ;;  %p286_p12 = scmp.lt.s32.totalorder %s18_s27, %s18_s27 }
  0x1c   :  { %p282_p11 = scmp.ne.s32.totalorder %s18_s27, %s281_s1  ;;  %p287_p13 = scmp.lt.s32.totalorder %s281_s1, %s281_s1 }
  0x1e   :  { %p288_p0 = por %p287_p13, %p286_p12 }
  0x20   :  { %p289_p1 = pnand %p288_p0, %p282_p11 }
  0x22   :  { %292 = shalt.err (!%p289_p1)
}
  0x23   :  { %20 = dma.hbm_to_vmem [thread:$0]  %s420_s0, 128, %s18_s27, [#allocation3]  }
  0x24   :  { %s293_s14 = scalar_lea.hbm %s422_s2, 16 }
  0x25   :  { %p294_p2 = scmp.ne.s32.totalorder %s422_s2, %s293_s14  ;;  %p297_p3 = scmp.lt.u32.totalorder %s293_s14, %s422_s2 }
  0x27   :  { %p299_p4 = pnand %p297_p3, %p294_p2 }
  0x29   :  { %302 = shalt.err (!%p299_p4)
}
  0x2a   :  { %s303_s19 = scalar_lea.vmem %s40_s29, 16  ;;  %s307_s20 = scalar_lea.vmem %s40_s29, 32 }
  0x2b   :  { %p304_p5 = scmp.ne.s32.totalorder %s40_s29, %s303_s19  ;;  %p308_p6 = scmp.lt.s32.totalorder %s40_s29, %s40_s29 }
  0x2c   :  { %p309_p7 = scmp.lt.s32.totalorder %s307_s20, %s303_s19 }
  0x2e   :  { %p310_p8 = por %p309_p7, %p308_p6 }
  0x30   :  { %p311_p9 = pnand %p310_p8, %p304_p5 }
  0x32   :  { %314 = shalt.err (!%p311_p9)
}
  0x33   :  { %42 = dma.hbm_to_vmem [thread:$0]  %s422_s2, 16, %s40_s29, [#allocation6]  }
  0x34   :  { %337 = dma.done.wait [#allocation3], 128  }
  0x35   :  { %338 = vsyncadd [#allocation3], 4294967168 }
  0x36   :  { %339 = dma.done.wait [#allocation6], 2064  }
  0x37   :  { %340 = vsyncadd [#allocation6], 4294965232  ;;  %v348_v0 = vmov 0.0|0.0   ;;  %vm349_vm0 = vmmov 0   ;;  %v350_v1 = vmov 0.0   ;;  %v53_v2 = vld [vmem:[#allocation5] sm:$0xff] }
  0x38   :  { %216 = vmatprep.subr.bf16.mxu0 %v348_v0  ;;  %213 = vmatprep.mubr.msk.f32.mxu0 %vm349_vm0, %v350_v1  ;;  %v54_v3 = vld [vmem:[#allocation5 + $0x8] sm:$0xff]  ;;  %v55_v4 = vld [vmem:[#allocation5 + $0x10] sm:$0xff]  ;;  %v56_v6 = vld [vmem:[#allocation5 + $0x18] sm:$0xff]  ;;  %s351_s2 = smov [#allocation8]  }
  0x39   :  { %v217_v5 = vpack.c.bf16 %v54_v3, %v53_v2  ;;  %v220_v7 = vpack.c.bf16 %v56_v6, %v55_v4  ;;  %v57_v8 = vld [vmem:[#allocation5 + $0x20] sm:$0xff]  ;;  %v58_v9 = vld [vmem:[#allocation5 + $0x28] sm:$0xff]  ;;  %v59_v11 = vld [vmem:[#allocation5 + $0x30] sm:$0xff]  ;;  %s153_s22 = sshll.u32 %s351_s2, 4  ;;  %s154_s22 = int_to_ptr.vmem [resolvable:$true] %s153_s22 }
  0x3a   :  { %v223_v10 = vpack.c.bf16 %v58_v9, %v57_v8  ;;  %v60_v12 = vld [vmem:[#allocation5 + $0x38] sm:$0xff]  ;;  %v61_v14 = vld [vmem:[#allocation5 + $0x40] sm:$0xff]  ;;  %v62_v15 = vld [vmem:[#allocation5 + $0x48] sm:$0xff]  ;;  %s315_s23 = scalar_lea.vmem %s154_s22, 128  ;;  %p320_p11 = scmp.lt.s32.totalorder %s154_s22, %s154_s22 }
  0x3b   :  { %218 = vmatpush3.bf16.msra.mxu0 %v217_v5  ;;  %v226_v13 = vpack.c.bf16 %v60_v12, %v59_v11  ;;  %v229_v16 = vpack.c.bf16 %v62_v15, %v61_v14  ;;  %v63_v17 = vld [vmem:[#allocation5 + $0x50] sm:$0xff]  ;;  %v64_v18 = vld [vmem:[#allocation5 + $0x58] sm:$0xff]  ;;  %v65_v20 = vld [vmem:[#allocation5 + $0x60] sm:$0xff]  ;;  %p316_p10 = scmp.ne.s32.totalorder %s154_s22, %s315_s23  ;;  %p321_p12 = scmp.lt.s32.totalorder %s315_s23, %s315_s23 }
  0x3c   :  { %219 = vmatprep.subr.bf16.mxu0 %v348_v0  ;;  %v232_v19 = vpack.c.bf16 %v64_v18, %v63_v17  ;;  %v66_v21 = vld [vmem:[#allocation5 + $0x68] sm:$0xff]  ;;  %v67_v23 = vld [vmem:[#allocation5 + $0x70] sm:$0xff]  ;;  %v68_v24 = vld [vmem:[#allocation5 + $0x78] sm:$0xff] }
  0x3d   :  { %v235_v22 = vpack.c.bf16 %v66_v21, %v65_v20  ;;  %v238_v25 = vpack.c.bf16 %v68_v24, %v67_v23  ;;  %v52_v26 = vld [vmem:[#allocation2] sm:$0xff]  ;;  %v163_v27 = vld [vmem:[#allocation7] ss:$0 sm:$0xff]  ;;  %p322_p13 = por %p321_p12, %p320_p11 }
  0x3f   :  { %221 = vmatpush3.bf16.msra.mxu0 %v220_v7  ;;  %p323_p0 = pnand %p322_p13, %p316_p10 }
  0x40   :  { %222 = vmatprep.subr.bf16.mxu0 %v348_v0 }
  0x43   :  { %224 = vmatpush3.bf16.msra.mxu0 %v223_v10 }
  0x44   :  { %225 = vmatprep.subr.bf16.mxu0 %v348_v0 }
  0x47   :  { %227 = vmatpush3.bf16.msra.mxu0 %v226_v13 }
  0x48   :  { %228 = vmatprep.subr.bf16.mxu0 %v348_v0 }
  0x4b   :  { %230 = vmatpush3.bf16.msra.mxu0 %v229_v16 }
  0x4c   :  { %231 = vmatprep.subr.bf16.mxu0 %v348_v0 }
  0x4f   :  { %233 = vmatpush3.bf16.msra.mxu0 %v232_v19 }
  0x50   :  { %234 = vmatprep.subr.bf16.mxu0 %v348_v0 }
  0x53   :  { %236 = vmatpush3.bf16.msra.mxu0 %v235_v22 }
  0x54   :  { %237 = vmatprep.subr.bf16.mxu0 %v348_v0 }
  0x57   :  { %239 = vmatpush3.bf16.msra.mxu0 %v238_v25 }
  0x5a   :  { %214 = vmatmul.mubr.f32.vlgmr.msra.gmra.mrb[0].mxu0 %v52_v26 }
 0x12d   :  { %v142_v28 = vpop.f32.mrb[0].mxu0 }
 0x12e   :  { %v143_v29 = vadd.f32 %v163_v27, %v142_v28  ;;  %v215_v30 = vpop.f32.mrb[1].mxu0 }
 0x130   :  { %146 = vst [vmem:[#allocation8] sm:$0xff] %v143_v29 }
 0x131   :  { %326 = shalt.err (!%p323_p0)
}
 0x132   :  { %s327_s26 = scalar_lea.hbm %s423_s3, 128 }
 0x133   :  { %p328_p1 = scmp.ne.s32.totalorder %s423_s3, %s327_s26  ;;  %p331_p2 = scmp.lt.u32.totalorder %s327_s26, %s423_s3 }
 0x135   :  { %p333_p3 = pnand %p331_p2, %p328_p1 }
 0x137   :  { %336 = shalt.err (!%p333_p3)
}
 0x138   :  { %156 = dma.vmem_to_hbm [thread:$0]  %s154_s22, 128, %s423_s3, [#allocation4]  }
 0x139   :  { %341 = dma.done.wait [#allocation4], 128  }
 0x13a   :  { %342 = vsyncadd [#allocation4], 4294967168 }
 0x13b   :  { %160 = vsyncpa [#allocation3], 1 }
 0x13c   :  { %161 = vsyncpa [#allocation6], 1 }
 0x13d   :  { %162 = vsyncpa [#allocation4], 1 }

</bundles_post_ra>
